<compile_context>
chip_gen: v7x
topology: tpu7x:2x2x1
jax: 0.10.0
libtpu: 0.0.40
codegen_flags: <defaults>
</compile_context>

<pallas_src>
import functools
import math

import jax
import jax.numpy as jnp
import numpy as np
from jax import lax
from jax.experimental import pallas as pl
from jax.experimental.pallas import tpu as pltpu

_HALF_LOG_2PI = 0.5 * math.log(2.0 * math.pi)


def _cdiv(a, b):
    return (a + b - 1) // b


def _round_up(a, b):
    return _cdiv(a, b) * b


def _svae_loss_kernel(x_ref, dmu_ref, dlv_ref, emu_ref, elv_ref, w_ref,
                      out_ref, nll_acc, kld_acc, l1_acc,
                      *, batch, n_wt, needs_mask):
    i = pl.program_id(1)
    g = pl.program_id(0) * pl.num_programs(1) + i     # global grid step

    @pl.when(i == 0)
    def _init():
        nll_acc[...] = jnp.zeros_like(nll_acc)
        kld_acc[...] = jnp.zeros_like(kld_acc)
        l1_acc[...] = jnp.zeros_like(l1_acc)

    tile_b, d = x_ref.shape
    z = emu_ref.shape[1]

    # Upcast so bf16 inputs are also accepted; accumulation stays f32.
    x = x_ref[...].astype(jnp.float32)
    dmu = dmu_ref[...].astype(jnp.float32)
    dlv = dlv_ref[...].astype(jnp.float32)
    diff = x - dmu
    # 0.5*log(2*pi) hoisted out of the per-element math (added in the wrapper).
    nll = 0.5 * (diff * diff) * jnp.exp(-dlv) + 0.5 * dlv

    emu = emu_ref[...].astype(jnp.float32)
    elv = elv_ref[...].astype(jnp.float32)
    kld = 1.0 + elv - emu * emu - jnp.exp(elv)

    if needs_mask:
        # Ragged last tile (and fully out-of-range clamped tiles): zero out
        # rows whose global row index is >= the true batch size.
        rows_valid = batch - g * tile_b
        nll = jnp.where(
            lax.broadcasted_iota(jnp.int32, (tile_b, d), 0) < rows_valid, nll, 0.0)
        kld = jnp.where(
            lax.broadcasted_iota(jnp.int32, (tile_b, z), 0) < rows_valid, kld, 0.0)

    # Row-fold into small (8, .) accumulators: reshape splits the sublane axis
    # only, so the leading-axis sum is pure vreg-wise VALU adds (no XLU).
    nll_acc[...] += jnp.sum(nll.reshape(tile_b // 8, 8, d), axis=0)
    kld_acc[...] += jnp.sum(kld.reshape(tile_b // 8, 8, z), axis=0)

    # Weight slab: only the first n_wt global steps own a real weight tile;
    # later steps re-see the (clamped) last tile but never accumulate it.
    @pl.when(g < n_wt)
    def _l1():
        w = jnp.abs(w_ref[...].astype(jnp.float32))
        tw = w.shape[0]
        l1_acc[...] += jnp.sum(w.reshape(tw // 8, 8, 128), axis=0)

    @pl.when(i == pl.num_programs(1) - 1)
    def _finalize():
        # One small cross-lane/cross-sublane reduction per term, once per core.
        out_ref[0, 0] = jnp.full((8, 128), jnp.sum(nll_acc[...]), jnp.float32)
        out_ref[0, 1] = jnp.full((8, 128), jnp.sum(kld_acc[...]), jnp.float32)
        out_ref[0, 2] = jnp.full((8, 128), jnp.sum(l1_acc[...]), jnp.float32)


@functools.partial(jax.jit,
                   static_argnames=("beta", "lambda1", "tile_b", "num_cores"))
def svae_loss(x, dec_mu, dec_logvar, enc_mu, enc_logvar, weights,
              *, beta=1.0, lambda1=1e-3, tile_b=None, num_cores=None):
    """Returns a (5,) f32 array: [loss, mean_nll, mean_mae, mean_kld, l1_reg]."""
    B, D = x.shape
    Z = enc_mu.shape[1]

    # ---- generation-aware defaults (trace-time host query) ------------------
    try:
        kind = jax.devices()[0].device_kind.lower()
    except Exception:  # pragma: no cover - defensive
        kind = ""
    two_tc = any(t in kind for t in ("v7", "v4", "v5p"))
    if num_cores is None:
        num_cores = 2 if two_tc else 1            # v5e/v6e: single TensorCore
    # v7x has 64 MiB VMEM per TC; v5e/v6e have 128 MiB physical.
    gen_cap = (48 << 20) if "v7" in kind else (96 << 20)

    # ---- tile_b from the VMEM budget (no wrapper-side batch padding) --------
    if tile_b is None:
        bpr = 2 * 4 * (3 * D + 2 * Z)             # double-buffered f32 bytes/row
        tile_b = max(8, min(int(gen_cap * 0.7) // max(1, bpr), 4096) // 8 * 8)
    tile_b = max(8, min(_round_up(tile_b, 8), _round_up(_cdiv(B, num_cores), 8)))

    n_w = sum(int(math.prod(w.shape)) for w in weights)
    w_rows = max(1, _cdiv(n_w, 128))

    # Shrink tile_b (rarely needed) until the working set fits the budget.
    while True:
        total_tiles = _cdiv(B, tile_b)
        nc = max(1, min(num_cores, total_tiles))
        steps = _cdiv(total_tiles, nc)
        tw = max(8, _round_up(_cdiv(w_rows, nc * steps), 8))
        est = 4 * (2 * (3 * tile_b * D + 2 * tile_b * Z + tw * 128)
                   + 8 * D + 8 * Z + 8 * 128 + 2 * 3 * 8 * 128)
        if est <= int(gen_cap * 0.85) or tile_b <= 8:
            break
        tile_b = max(8, (tile_b // 2) // 8 * 8)

    n_wt = max(1, _cdiv(w_rows, tw))              # real weight tiles (<= nc*steps)
    needs_mask = (nc * steps * tile_b != B)
    last_blk = total_tiles - 1
    # Always set the scoped-VMEM limit explicitly (v5e default is only 16 MiB).
    vmem_limit = int(min(gen_cap, max(2 * est, 32 << 20)))

    # Pack all non-bias weights into one zero-padded (n_wt*tw, 128) f32 slab
    # sized from the weight count only (|0| does not change ||.||_1).
    # TODO(synk): the concatenate is a wrapper-side copy; a real training setup
    # would keep the parameters pre-packed to avoid this extra HBM round trip.
    if weights:
        w_flat = jnp.concatenate([jnp.ravel(w).astype(jnp.float32) for w in weights])
    else:
        w_flat = jnp.zeros((0,), jnp.float32)
    w_packed = jnp.pad(w_flat, (0, n_wt * tw * 128 - n_w)).reshape(n_wt * tw, 128)

    # Clamped index maps: out-of-range steps re-see the last valid block
    # (unchanged block index => Pallas skips the DMA), contributions masked.
    row_map = lambda c, i: (jnp.minimum(c * steps + i, last_blk), 0)
    w_map = lambda c, i: (jnp.minimum(c * steps + i, n_wt - 1), 0)

    kernel = functools.partial(_svae_loss_kernel, batch=B, n_wt=n_wt,
                               needs_mask=needs_mask)

    # TODO(synk): if a profile shows exposed DMA gaps on 128-MiB parts, bump
    # the three (tile_b, D) inputs to pipeline_mode=pl.Buffered(3).
    partials = pl.pallas_call(
        kernel,
        out_shape=jax.ShapeDtypeStruct((nc, 3, 8, 128), jnp.float32),
        grid_spec=pltpu.PrefetchScalarGridSpec(
            num_scalar_prefetch=0,
            grid=(nc, steps),
            in_specs=[
                pl.BlockSpec((tile_b, D), row_map),   # x
                pl.BlockSpec((tile_b, D), row_map),   # dec_mu
                pl.BlockSpec((tile_b, D), row_map),   # dec_logvar
                pl.BlockSpec((tile_b, Z), row_map),   # enc_mu
                pl.BlockSpec((tile_b, Z), row_map),   # enc_logvar
                pl.BlockSpec((tw, 128), w_map),       # packed weights
            ],
            out_specs=pl.BlockSpec((1, 3, 8, 128), lambda c, i: (c, 0, 0, 0)),
            scratch_shapes=[
                pltpu.VMEM((8, D), jnp.float32),      # nll partial sums
                pltpu.VMEM((8, Z), jnp.float32),      # kld partial sums
                pltpu.VMEM((8, 128), jnp.float32),    # l1 partial sums
            ],
        ),
        compiler_params=pltpu.CompilerParams(
            dimension_semantics=("parallel", "arbitrary"),
            vmem_limit_bytes=vmem_limit,
        ),
    )(x, dec_mu, dec_logvar, enc_mu, enc_logvar, w_packed)

    # Combine per-core partial sums; divisor is the TRUE batch size.
    sums = jnp.sum(partials[:, :, 0, 0], axis=0)       # [nll_raw, kld_raw, l1_raw]
    nll_mean = sums[0] / B + D * _HALF_LOG_2PI          # hoisted constant added back
    kld_mean = (-beta * 0.5) * sums[1] / B
    l1 = lambda1 * sums[2]
    loss = nll_mean + kld_mean + l1
    # TODO(synk): PyTorch returns Python floats via .item(); here the scalars
    # stay on-device in a (5,) array (mae is identically 0 in the reference).
    return jnp.stack([loss, nll_mean, jnp.float32(0.0), kld_mean, l1])


def _reference(x, dec_mu, dec_logvar, enc_mu, enc_logvar, weights, beta, lambda1):
    nll = jnp.sum(
        0.5 * (x - dec_mu) ** 2 * jnp.exp(-dec_logvar)
        + 0.5 * dec_logvar + _HALF_LOG_2PI, axis=1)
    kld = -beta * 0.5 * jnp.sum(
        1 + enc_logvar - enc_mu**2 - jnp.exp(enc_logvar), axis=1)
    l1 = lambda1 * sum(jnp.sum(jnp.abs(w)) for w in weights)
    loss = jnp.mean(nll) + jnp.mean(kld) + l1
    return jnp.stack([loss, jnp.mean(nll), jnp.float32(0.0), jnp.mean(kld), l1])


def _make_inputs(key, B, D, Z, H):
    ks = jax.random.split(key, 9)
    x = jax.random.normal(ks[0], (B, D), dtype=jnp.float32)
    dec_mu = jax.random.normal(ks[1], (B, D), dtype=jnp.float32)
    dec_logvar = 0.1 * jax.random.normal(ks[2], (B, D), dtype=jnp.float32)
    enc_mu = jax.random.normal(ks[3], (B, Z), dtype=jnp.float32)
    enc_logvar = 0.1 * jax.random.normal(ks[4], (B, Z), dtype=jnp.float32)
    # Synthetic non-bias model parameters (biases are excluded from L1 in the
    # reference module).
    weights = (
        0.05 * jax.random.normal(ks[5], (H, D), dtype=jnp.float32),   # enc fc1.weight
        0.05 * jax.random.normal(ks[6], (Z, H), dtype=jnp.float32),   # enc fc_mu.weight
        0.05 * jax.random.normal(ks[7], (Z, H), dtype=jnp.float32),   # enc fc_logvar.weight
        0.05 * jax.random.normal(ks[8], (D, Z), dtype=jnp.float32),   # dec fc.weight
    )
    return x, dec_mu, dec_logvar, enc_mu, enc_logvar, weights


if __name__ == "__main__":
    D, Z, H = 128, 32, 64
    key = jax.random.PRNGKey(0)
    k1, k2 = jax.random.split(key)

    # Case 1: batch divides the tiling exactly (no in-kernel masking needed).
    args1 = _make_inputs(k1, 64, D, Z, H)
    out1 = jax.block_until_ready(svae_loss(*args1, beta=1.0, lambda1=1e-3))
    ref1 = jax.block_until_ready(_reference(*args1, 1.0, 1e-3))
    np.testing.assert_allclose(np.asarray(out1), np.asarray(ref1),
                               rtol=2e-5, atol=1e-4)

    # Case 2: ragged batch (exercises the in-kernel last-tile masking path,
    # replacing the old wrapper-side jnp.pad pass over every batch array).
    args2 = _make_inputs(k2, 50, D, Z, H)
    out2 = jax.block_until_ready(svae_loss(*args2, beta=0.7, lambda1=2e-3))
    ref2 = jax.block_until_ready(_reference(*args2, 0.7, 2e-3))
    np.testing.assert_allclose(np.asarray(out2), np.asarray(ref2),
                               rtol=2e-5, atol=1e-4)

    print("KERNEL_OK")
</pallas_src>

<mosaic_0001>
module attributes {stable_mosaic.version = 11 : i64} {
  func.func @_svae_loss_kernel(%arg0: i32, %arg1: i32, %arg2: memref<64x128xf32, #tpu.memory_space<vmem>>, %arg3: memref<64x128xf32, #tpu.memory_space<vmem>>, %arg4: memref<64x128xf32, #tpu.memory_space<vmem>>, %arg5: memref<64x32xf32, #tpu.memory_space<vmem>>, %arg6: memref<64x32xf32, #tpu.memory_space<vmem>>, %arg7: memref<128x128xf32, #tpu.memory_space<vmem>>, %arg8: memref<1x3x8x128xf32, #tpu.memory_space<vmem>>, %arg9: memref<8x128xf32, #tpu.memory_space<vmem>>, %arg10: memref<8x32xf32, #tpu.memory_space<vmem>>, %arg11: memref<8x128xf32, #tpu.memory_space<vmem>>) attributes {dimension_semantics = [#tpu.dimension_semantics<parallel>, #tpu.dimension_semantics<arbitrary>], iteration_bounds = array<i64: 1, 1>, scalar_prefetch = 0 : i64, scratch_operands = 3 : i64, tpu.core_type = #tpu.core_type<tc>, window_params = [{transform_indices = @transform_0, window_bounds = array<i64: 64, 128>}, {transform_indices = @transform_1, window_bounds = array<i64: 64, 128>}, {transform_indices = @transform_2, window_bounds = array<i64: 64, 128>}, {transform_indices = @transform_3, window_bounds = array<i64: 64, 32>}, {transform_indices = @transform_4, window_bounds = array<i64: 64, 32>}, {transform_indices = @transform_5, window_bounds = array<i64: 128, 128>}, {transform_indices = @transform_6, window_bounds = array<i64: 1, 3, 8, 128>}]} {
    %c1_i32 = arith.constant 1 : i32
    %0 = arith.muli %arg0, %c1_i32 : i32
    %1 = arith.addi %0, %arg1 : i32
    %c0_i32 = arith.constant 0 : i32
    %2 = arith.cmpi eq, %arg1, %c0_i32 : i32
    %3 = arith.extui %2 : i1 to i32
    %c0_i32_0 = arith.constant 0 : i32
    %4 = arith.cmpi ne, %3, %c0_i32_0 : i32
    scf.if %4 {
      %cst_27 = arith.constant 0.000000e+00 : f32
      %43 = vector.broadcast %cst_27 : f32 to vector<8x128xf32>
      %c0_28 = arith.constant 0 : index
      %c0_29 = arith.constant 0 : index
      %44 = vector.load %arg9[%c0_28, %c0_29] : memref<8x128xf32, #tpu.memory_space<vmem>>, vector<8x128xf32>
      tpu.vector_store %arg9[%c0_28, %c0_29], %43 {strides = array<i32>} : memref<8x128xf32, #tpu.memory_space<vmem>>, vector<8x128xf32>,
      %cst_30 = arith.constant 0.000000e+00 : f32
      %45 = vector.broadcast %cst_30 : f32 to vector<8x32xf32>
      %c0_31 = arith.constant 0 : index
      %c0_32 = arith.constant 0 : index
      %46 = vector.load %arg10[%c0_31, %c0_32] : memref<8x32xf32, #tpu.memory_space<vmem>>, vector<8x32xf32>
      tpu.vector_store %arg10[%c0_31, %c0_32], %45 {strides = array<i32>} : memref<8x32xf32, #tpu.memory_space<vmem>>, vector<8x32xf32>,
      %cst_33 = arith.constant 0.000000e+00 : f32
      %47 = vector.broadcast %cst_33 : f32 to vector<8x128xf32>
      %c0_34 = arith.constant 0 : index
      %c0_35 = arith.constant 0 : index
      %48 = vector.load %arg11[%c0_34, %c0_35] : memref<8x128xf32, #tpu.memory_space<vmem>>, vector<8x128xf32>
      tpu.vector_store %arg11[%c0_34, %c0_35], %47 {strides = array<i32>} : memref<8x128xf32, #tpu.memory_space<vmem>>, vector<8x128xf32>,
    } else {
    }
    %c0 = arith.constant 0 : index
    %c0_1 = arith.constant 0 : index
    %5 = vector.load %arg2[%c0, %c0_1] : memref<64x128xf32, #tpu.memory_space<vmem>>, vector<64x128xf32>
    %c0_2 = arith.constant 0 : index
    %c0_3 = arith.constant 0 : index
    %6 = vector.load %arg3[%c0_2, %c0_3] : memref<64x128xf32, #tpu.memory_space<vmem>>, vector<64x128xf32>
    %c0_4 = arith.constant 0 : index
    %c0_5 = arith.constant 0 : index
    %7 = vector.load %arg4[%c0_4, %c0_5] : memref<64x128xf32, #tpu.memory_space<vmem>>, vector<64x128xf32>
    %8 = arith.subf %5, %6 : vector<64x128xf32>
    %9 = arith.mulf %8, %8 : vector<64x128xf32>
    %cst = arith.constant 5.000000e-01 : f32
    %10 = vector.broadcast %cst : f32 to vector<64x128xf32>
    %11 = arith.mulf %10, %9 : vector<64x128xf32>
    %cst_6 = arith.constant 0.000000e+00 : f32
    %12 = vector.broadcast %cst_6 : f32 to vector<64x128xf32>
    %13 = arith.subf %12, %7 : vector<64x128xf32>
    %14 = math.exp %13 : vector<64x128xf32>
    %15 = arith.mulf %11, %14 : vector<64x128xf32>
    %cst_7 = arith.constant 5.000000e-01 : f32
    %16 = vector.broadcast %cst_7 : f32 to vector<64x128xf32>
    %17 = arith.mulf %16, %7 : vector<64x128xf32>
    %18 = arith.addf %15, %17 : vector<64x128xf32>
    %c0_8 = arith.constant 0 : index
    %c0_9 = arith.constant 0 : index
    %19 = vector.load %arg5[%c0_8, %c0_9] : memref<64x32xf32, #tpu.memory_space<vmem>>, vector<64x32xf32>
    %c0_10 = arith.constant 0 : index
    %c0_11 = arith.constant 0 : index
    %20 = vector.load %arg6[%c0_10, %c0_11] : memref<64x32xf32, #tpu.memory_space<vmem>>, vector<64x32xf32>
    %cst_12 = arith.constant 1.000000e+00 : f32
    %21 = vector.broadcast %cst_12 : f32 to vector<64x32xf32>
    %22 = arith.addf %21, %20 : vector<64x32xf32>
    %23 = arith.mulf %19, %19 : vector<64x32xf32>
    %24 = arith.subf %22, %23 : vector<64x32xf32>
    %25 = math.exp %20 : vector<64x32xf32>
    %26 = arith.subf %24, %25 : vector<64x32xf32>
    %c0_13 = arith.constant 0 : index
    %c0_14 = arith.constant 0 : index
    %27 = vector.load %arg9[%c0_13, %c0_14] : memref<8x128xf32, #tpu.memory_space<vmem>>, vector<8x128xf32>
    %28 = vector.shape_cast %18 : vector<64x128xf32> to vector<8x8x128xf32>
    %cst_15 = arith.constant dense<0.000000e+00> : vector<8x128xf32>
    %29 = vector.multi_reduction <add>, %28, %cst_15 [0] : vector<8x8x128xf32> to vector<8x128xf32>
    %30 = arith.addf %27, %29 : vector<8x128xf32>
    %c0_16 = arith.constant 0 : index
    %c0_17 = arith.constant 0 : index
    %31 = vector.load %arg9[%c0_16, %c0_17] : memref<8x128xf32, #tpu.memory_space<vmem>>, vector<8x128xf32>
    tpu.vector_store %arg9[%c0_16, %c0_17], %30 {strides = array<i32>} : memref<8x128xf32, #tpu.memory_space<vmem>>, vector<8x128xf32>,
    %c0_18 = arith.constant 0 : index
    %c0_19 = arith.constant 0 : index
    %32 = vector.load %arg10[%c0_18, %c0_19] : memref<8x32xf32, #tpu.memory_space<vmem>>, vector<8x32xf32>
    %33 = vector.shape_cast %26 : vector<64x32xf32> to vector<8x8x32xf32>
    %cst_20 = arith.constant dense<0.000000e+00> : vector<8x32xf32>
    %34 = vector.multi_reduction <add>, %33, %cst_20 [0] : vector<8x8x32xf32> to vector<8x32xf32>
    %35 = arith.addf %32, %34 : vector<8x32xf32>
    %c0_21 = arith.constant 0 : index
    %c0_22 = arith.constant 0 : index
    %36 = vector.load %arg10[%c0_21, %c0_22] : memref<8x32xf32, #tpu.memory_space<vmem>>, vector<8x32xf32>
    tpu.vector_store %arg10[%c0_21, %c0_22], %35 {strides = array<i32>} : memref<8x32xf32, #tpu.memory_space<vmem>>, vector<8x32xf32>,
    %c1_i32_23 = arith.constant 1 : i32
    %37 = arith.cmpi slt, %1, %c1_i32_23 : i32
    %38 = arith.extui %37 : i1 to i32
    %c0_i32_24 = arith.constant 0 : i32
    %39 = arith.cmpi ne, %38, %c0_i32_24 : i32
    scf.if %39 {
      %c0_27 = arith.constant 0 : index
      %c0_28 = arith.constant 0 : index
      %43 = vector.load %arg7[%c0_27, %c0_28] : memref<128x128xf32, #tpu.memory_space<vmem>>, vector<128x128xf32>
      %44 = math.absf %43 : vector<128x128xf32>
      %c0_29 = arith.constant 0 : index
      %c0_30 = arith.constant 0 : index
      %45 = vector.load %arg11[%c0_29, %c0_30] : memref<8x128xf32, #tpu.memory_space<vmem>>, vector<8x128xf32>
      %46 = vector.shape_cast %44 : vector<128x128xf32> to vector<16x8x128xf32>
      %cst_31 = arith.constant dense<0.000000e+00> : vector<8x128xf32>
      %47 = vector.multi_reduction <add>, %46, %cst_31 [0] : vector<16x8x128xf32> to vector<8x128xf32>
      %48 = arith.addf %45, %47 : vector<8x128xf32>
      %c0_32 = arith.constant 0 : index
      %c0_33 = arith.constant 0 : index
      %49 = vector.load %arg11[%c0_32, %c0_33] : memref<8x128xf32, #tpu.memory_space<vmem>>, vector<8x128xf32>
      tpu.vector_store %arg11[%c0_32, %c0_33], %48 {strides = array<i32>} : memref<8x128xf32, #tpu.memory_space<vmem>>, vector<8x128xf32>,
    } else {
    }
    %c0_i32_25 = arith.constant 0 : i32
    %40 = arith.cmpi eq, %arg1, %c0_i32_25 : i32
    %41 = arith.extui %40 : i1 to i32
    %c0_i32_26 = arith.constant 0 : i32
    %42 = arith.cmpi ne, %41, %c0_i32_26 : i32
    scf.if %42 {
      %c0_27 = arith.constant 0 : index
      %c0_28 = arith.constant 0 : index
      %43 = vector.load %arg9[%c0_27, %c0_28] : memref<8x128xf32, #tpu.memory_space<vmem>>, vector<8x128xf32>
      %44 = vector.shape_cast %43 : vector<8x128xf32> to vector<1x8x128xf32>
      %cst_29 = arith.constant dense<0.000000e+00> : vector<1xf32>
      %45 = vector.multi_reduction <add>, %44, %cst_29 [1, 2] : vector<1x8x128xf32> to vector<1xf32>
      %46 = vector.shape_cast %45 : vector<1xf32> to vector<1x1x1xf32>
      %47 = vector.extract %46[0, 0, 0] : f32 from vector<1x1x1xf32>
      %48 = vector.broadcast %47 : f32 to vector<8x128xf32>
      %c0_30 = arith.constant 0 : index
      %c0_31 = arith.constant 0 : index
      %c0_32 = arith.constant 0 : index
      %c0_33 = arith.constant 0 : index
      %49 = vector.load %arg8[%c0_30, %c0_31, %c0_32, %c0_33] : memref<1x3x8x128xf32, #tpu.memory_space<vmem>>, vector<1x1x8x128xf32>
      %50 = vector.shape_cast %49 : vector<1x1x8x128xf32> to vector<8x128xf32>
      %51 = vector.shape_cast %48 : vector<8x128xf32> to vector<1x1x8x128xf32>
      tpu.vector_store %arg8[%c0_30, %c0_31, %c0_32, %c0_33], %51 {strides = array<i32>} : memref<1x3x8x128xf32, #tpu.memory_space<vmem>>, vector<1x1x8x128xf32>,
      %c0_34 = arith.constant 0 : index
      %c0_35 = arith.constant 0 : index
      %52 = vector.load %arg10[%c0_34, %c0_35] : memref<8x32xf32, #tpu.memory_space<vmem>>, vector<8x32xf32>
      %53 = vector.shape_cast %52 : vector<8x32xf32> to vector<1x8x32xf32>
      %cst_36 = arith.constant dense<0.000000e+00> : vector<1xf32>
      %54 = vector.multi_reduction <add>, %53, %cst_36 [1, 2] : vector<1x8x32xf32> to vector<1xf32>
      %55 = vector.shape_cast %54 : vector<1xf32> to vector<1x1x1xf32>
      %56 = vector.extract %55[0, 0, 0] : f32 from vector<1x1x1xf32>
      %57 = vector.broadcast %56 : f32 to vector<8x128xf32>
      %c0_37 = arith.constant 0 : index
      %c1 = arith.constant 1 : index
      %c0_38 = arith.constant 0 : index
      %c0_39 = arith.constant 0 : index
      %58 = vector.load %arg8[%c0_37, %c1, %c0_38, %c0_39] : memref<1x3x8x128xf32, #tpu.memory_space<vmem>>, vector<1x1x8x128xf32>
      %59 = vector.shape_cast %58 : vector<1x1x8x128xf32> to vector<8x128xf32>
      %60 = vector.shape_cast %57 : vector<8x128xf32> to vector<1x1x8x128xf32>
      tpu.vector_store %arg8[%c0_37, %c1, %c0_38, %c0_39], %60 {strides = array<i32>} : memref<1x3x8x128xf32, #tpu.memory_space<vmem>>, vector<1x1x8x128xf32>,
      %c0_40 = arith.constant 0 : index
      %c0_41 = arith.constant 0 : index
      %61 = vector.load %arg11[%c0_40, %c0_41] : memref<8x128xf32, #tpu.memory_space<vmem>>, vector<8x128xf32>
      %62 = vector.shape_cast %61 : vector<8x128xf32> to vector<1x8x128xf32>
      %cst_42 = arith.constant dense<0.000000e+00> : vector<1xf32>
      %63 = vector.multi_reduction <add>, %62, %cst_42 [1, 2] : vector<1x8x128xf32> to vector<1xf32>
      %64 = vector.shape_cast %63 : vector<1xf32> to vector<1x1x1xf32>
      %65 = vector.extract %64[0, 0, 0] : f32 from vector<1x1x1xf32>
      %66 = vector.broadcast %65 : f32 to vector<8x128xf32>
      %c0_43 = arith.constant 0 : index
      %c2 = arith.constant 2 : index
      %c0_44 = arith.constant 0 : index
      %c0_45 = arith.constant 0 : index
      %67 = vector.load %arg8[%c0_43, %c2, %c0_44, %c0_45] : memref<1x3x8x128xf32, #tpu.memory_space<vmem>>, vector<1x1x8x128xf32>
      %68 = vector.shape_cast %67 : vector<1x1x8x128xf32> to vector<8x128xf32>
      %69 = vector.shape_cast %66 : vector<8x128xf32> to vector<1x1x8x128xf32>
      tpu.vector_store %arg8[%c0_43, %c2, %c0_44, %c0_45], %69 {strides = array<i32>} : memref<1x3x8x128xf32, #tpu.memory_space<vmem>>, vector<1x1x8x128xf32>,
    } else {
    }
    return
  }
  func.func @transform_0(%arg0: i32, %arg1: i32) -> (i32, i32) {
    %c1_i32 = arith.constant 1 : i32
    %0 = arith.muli %arg0, %c1_i32 : i32
    %1 = arith.addi %0, %arg1 : i32
    %c0_i32 = arith.constant 0 : i32
    %2 = arith.minsi %1, %c0_i32 : i32
    %c0_i32_0 = arith.constant 0 : i32
    %c0_i32_1 = arith.constant 0 : i32
    return %2, %c0_i32_0 : i32, i32
  }
  func.func @transform_1(%arg0: i32, %arg1: i32) -> (i32, i32) {
    %c1_i32 = arith.constant 1 : i32
    %0 = arith.muli %arg0, %c1_i32 : i32
    %1 = arith.addi %0, %arg1 : i32
    %c0_i32 = arith.constant 0 : i32
    %2 = arith.minsi %1, %c0_i32 : i32
    %c0_i32_0 = arith.constant 0 : i32
    %c0_i32_1 = arith.constant 0 : i32
    return %2, %c0_i32_0 : i32, i32
  }
  func.func @transform_2(%arg0: i32, %arg1: i32) -> (i32, i32) {
    %c1_i32 = arith.constant 1 : i32
    %0 = arith.muli %arg0, %c1_i32 : i32
    %1 = arith.addi %0, %arg1 : i32
    %c0_i32 = arith.constant 0 : i32
    %2 = arith.minsi %1, %c0_i32 : i32
    %c0_i32_0 = arith.constant 0 : i32
    %c0_i32_1 = arith.constant 0 : i32
    return %2, %c0_i32_0 : i32, i32
  }
  func.func @transform_3(%arg0: i32, %arg1: i32) -> (i32, i32) {
    %c1_i32 = arith.constant 1 : i32
    %0 = arith.muli %arg0, %c1_i32 : i32
    %1 = arith.addi %0, %arg1 : i32
    %c0_i32 = arith.constant 0 : i32
    %2 = arith.minsi %1, %c0_i32 : i32
    %c0_i32_0 = arith.constant 0 : i32
    %c0_i32_1 = arith.constant 0 : i32
    return %2, %c0_i32_0 : i32, i32
  }
  func.func @transform_4(%arg0: i32, %arg1: i32) -> (i32, i32) {
    %c1_i32 = arith.constant 1 : i32
    %0 = arith.muli %arg0, %c1_i32 : i32
    %1 = arith.addi %0, %arg1 : i32
    %c0_i32 = arith.constant 0 : i32
    %2 = arith.minsi %1, %c0_i32 : i32
    %c0_i32_0 = arith.constant 0 : i32
    %c0_i32_1 = arith.constant 0 : i32
    return %2, %c0_i32_0 : i32, i32
  }
  func.func @transform_5(%arg0: i32, %arg1: i32) -> (i32, i32) {
    %c1_i32 = arith.constant 1 : i32
    %0 = arith.muli %arg0, %c1_i32 : i32
    %1 = arith.addi %0, %arg1 : i32
    %c0_i32 = arith.constant 0 : i32
    %2 = arith.minsi %1, %c0_i32 : i32
    %c0_i32_0 = arith.constant 0 : i32
    %c0_i32_1 = arith.constant 0 : i32
    return %2, %c0_i32_0 : i32, i32
  }
  func.func @transform_6(%arg0: i32, %arg1: i32) -> (i32, i32, i32, i32) {
    %c0_i32 = arith.constant 0 : i32
    %c0_i32_0 = arith.constant 0 : i32
    %c0_i32_1 = arith.constant 0 : i32
    %c0_i32_2 = arith.constant 0 : i32
    return %arg0, %c0_i32, %c0_i32_0, %c0_i32_1 : i32, i32, i32, i32
  }
}

</mosaic_0001>

<bundles_post_ra>
// kernel: svae_loss.1
= control target key start
LH: loop header
LB: loop body
LE: loop exit
PB: predicated region body
PF: predicated region fallthrough
CT: control target
= control target key end

     0   :  { %vm221_vm0 = vcmask 261120   ;;  %v590_v0 = vmov 0.0   ;;  %s858_s2 = inlined_call_operand.vmem [shape: f32[64,128], index: 2, kind: input, shape index: {}]   ;;  %s859_s0 = inlined_call_operand.vmem [shape: f32[64,128], index: 0, kind: input, shape index: {}]   ;;  %s860_s1 = inlined_call_operand.vmem [shape: f32[64,128], index: 1, kind: input, shape index: {}]   ;;  %s861_s5 = inlined_call_operand.vmem [shape: f32[128,128], index: 5, kind: input, shape index: {}]   ;;  %s862_s4 = inlined_call_operand.vmem [shape: f32[64,32], index: 4, kind: input, shape index: {}]   ;;  %s863_s3 = inlined_call_operand.vmem [shape: f32[64,32], index: 3, kind: input, shape index: {}]   ;;  %s864_s6 = inlined_call_operand.vmem [shape: f32[1,3,8,128], index: 6, kind: output, shape index: {}]  }
   0x1   :  { %222 = vst.msk [vmem:[#allocation3] sm:$0xff] %vm221_vm0, %v590_v0  ;;  %v630_v1 = vld [vmem:[%s858_s2] sm:$0xff]  ;;  %v635_v2 = vld [vmem:[%s858_s2 + $0x8] sm:$0xff]  ;;  %v640_v3 = vld [vmem:[%s858_s2 + $0x10] sm:$0xff] }
   0x2   :  { %v645_v4 = vld [vmem:[%s858_s2 + $0x18] sm:$0xff]  ;;  %v650_v5 = vld [vmem:[%s858_s2 + $0x20] sm:$0xff]  ;;  %v655_v6 = vld [vmem:[%s858_s2 + $0x28] sm:$0xff]  ;;  %v272_v11 = vsub.f32 0.0, %v630_v1  ;;  %v273_v17 = vsub.f32 0.0, %v635_v2  ;;  %v274_v18 = vsub.f32 0.0, %v640_v3 }
   0x3   :  { %v660_v7 = vld [vmem:[%s858_s2 + $0x30] sm:$0xff]  ;;  %v224_v8 = vld [vmem:[%s859_s0] sm:$0xff]  ;;  %v225_v9 = vld [vmem:[%s859_s0 + $0x8] sm:$0xff]  ;;  %v275_v19 = vsub.f32 0.0, %v645_v4  ;;  %v276_v24 = vsub.f32 0.0, %v650_v5  ;;  %v277_v25 = vsub.f32 0.0, %v655_v6 }
   0x4   :  { %v226_v10 = vld [vmem:[%s859_s0 + $0x10] sm:$0xff]  ;;  %v227_v12 = vld [vmem:[%s859_s0 + $0x18] sm:$0xff]  ;;  %v228_v13 = vld [vmem:[%s859_s0 + $0x20] sm:$0xff]  ;;  %v278_v26 = vsub.f32 0.0, %v660_v7  ;;  %v280_v27 = vmul.f32 1.442695, %v272_v11 }
   0x5   :  { %v232_v14 = vld [vmem:[%s860_s1] sm:$0xff]  ;;  %v233_v15 = vld [vmem:[%s860_s1 + $0x8] sm:$0xff]  ;;  %v687_v16 = vld [vmem:[%s858_s2 + $0x38] sm:$0xff]  ;;  %v282_v28 = vmul.f32 1.442695, %v273_v17 }
   0x6   :  { %v229_v20 = vld [vmem:[%s859_s0 + $0x28] sm:$0xff]  ;;  %v234_v21 = vld [vmem:[%s860_s1 + $0x10] sm:$0xff]  ;;  %v235_v22 = vld [vmem:[%s860_s1 + $0x18] sm:$0xff]  ;;  %v284_v29 = vmul.f32 1.442695, %v274_v18  ;;  %v248_v33 = vsub.f32 %v224_v8, %v232_v14  ;;  %v279_v34 = vsub.f32 0.0, %v687_v16  ;;  %v249_v38 = vsub.f32 %v225_v9, %v233_v15 }
   0x7   :  { %v236_v23 = vld [vmem:[%s860_s1 + $0x20] sm:$0xff]  ;;  %v230_v30 = vld [vmem:[%s859_s0 + $0x30] sm:$0xff]  ;;  %v237_v31 = vld [vmem:[%s860_s1 + $0x28] sm:$0xff]  ;;  %v286_v35 = vmul.f32 1.442695, %v275_v19  ;;  %v250_v39 = vsub.f32 %v226_v10, %v234_v21  ;;  %558 = vpow2.f32 %v280_v27  ;;  %v251_v41 = vsub.f32 %v227_v12, %v235_v22 }
   0x8   :  { %v238_v32 = vld [vmem:[%s860_s1 + $0x30] sm:$0xff]  ;;  %v231_v36 = vld [vmem:[%s859_s0 + $0x38] sm:$0xff]  ;;  %v288_v40 = vmul.f32 1.442695, %v276_v24  ;;  %v252_v42 = vsub.f32 %v228_v13, %v236_v23  ;;  %560 = vpow2.f32 %v282_v28  ;;  %v290_v43 = vmul.f32 1.442695, %v277_v25 }
   0x9   :  { %v239_v37 = vld [vmem:[%s860_s1 + $0x38] sm:$0xff]  ;;  %v417_v44 = vld [vmem:[%s861_s5] sm:$0xff]  ;;  %v418_v45 = vld [vmem:[%s861_s5 + $0x8] sm:$0xff]  ;;  %v253_v46 = vsub.f32 %v229_v20, %v237_v31  ;;  %v254_v47 = vsub.f32 %v230_v30, %v238_v32  ;;  %562 = vpow2.f32 %v284_v29  ;;  %v292_v48 = vmul.f32 1.442695, %v278_v26 }
   0xa   :  { %v255_v49 = vsub.f32 %v231_v36, %v239_v37  ;;  %v256_v50 = vmul.f32 %v248_v33, %v248_v33  ;;  %564 = vpow2.f32 %v286_v35  ;;  %v294_v51 = vmul.f32 1.442695, %v279_v34  ;;  %v419_v52 = vld [vmem:[%s861_s5 + $0x10] sm:$0xff]  ;;  %v420_v59 = vld [vmem:[%s861_s5 + $0x18] sm:$0xff]  ;;  %v421_v8 = vld [vmem:[%s861_s5 + $0x20] sm:$0xff] }
   0xb   :  { %v257_v53 = vmul.f32 %v249_v38, %v249_v38  ;;  %566 = vpow2.f32 %v288_v40  ;;  %v433_v54 = vand.u32 2147483647, %v417_v44  ;;  %v434_v55 = vand.u32 2147483647, %v418_v45  ;;  %v422_v17 = vld [vmem:[%s861_s5 + $0x28] sm:$0xff] }
   0xc   :  { %v258_v56 = vmul.f32 %v250_v39, %v250_v39  ;;  %v259_v57 = vmul.f32 %v251_v41, %v251_v41  ;;  %v260_v58 = vmul.f32 %v252_v42, %v252_v42  ;;  %568 = vpow2.f32 %v290_v43  ;;  %v426_v40 = vld [vmem:[%s861_s5 + $0x48] sm:$0xff] }
   0xd   :  { %v261_v60 = vmul.f32 %v253_v46, %v253_v46  ;;  %570 = vpow2.f32 %v292_v48  ;;  %v435_v61 = vand.u32 2147483647, %v419_v52  ;;  %v262_v62 = vmul.f32 %v254_v47, %v254_v47  ;;  %v771_v52 = vld [vmem:[%s861_s5 + $0x60] sm:$0xff] }
   0xe   :  { %v263_v63 = vmul.f32 %v255_v49, %v255_v49  ;;  %v264_v0 = vmul.f32 0.5, %v256_v50  ;;  %572 = vpow2.f32 %v294_v51  ;;  %v265_v9 = vmul.f32 0.5, %v257_v53  ;;  %v766_v51 = vld [vmem:[%s861_s5 + $0x58] sm:$0xff] }
   0xf   :  { %v436_v10 = vand.u32 2147483647, %v420_v59  ;;  %v450_v11 = vadd.f32 %v434_v55, %v433_v54  ;;  %v266_v12 = vmul.f32 0.5, %v258_v56  ;;  %v267_v13 = vmul.f32 0.5, %v259_v57  ;;  %v777_v56 = vld [vmem:[%s861_s5 + $0x68] sm:$0xff] }
  0x10   :  { %v268_v14 = vmul.f32 0.5, %v260_v58  ;;  %v304_v15 = vmul.f32 0.5, %v630_v1  ;;  %v269_v19 = vmul.f32 0.5, %v261_v60  ;;  %v305_v20 = vmul.f32 0.5, %v635_v2  ;;  %v423_v1 = vld [vmem:[%s861_s5 + $0x30] sm:$0xff]  ;;  %v424_v2 = vld [vmem:[%s861_s5 + $0x38] sm:$0xff] }
  0x11   :  { %v559_v18 = vpop.eup %558  ;;  %v437_v21 = vand.u32 2147483647, %v421_v8  ;;  %v451_v22 = vadd.f32 %v450_v11, %v435_v61  ;;  %v270_v24 = vmul.f32 0.5, %v262_v62  ;;  %v271_v25 = vmul.f32 0.5, %v263_v63  ;;  %v328_v63 = vld [vmem:[%s862_s4] sm:$0xff]  ;;  %v331_v11 = vld [vmem:[%s862_s4 + $0x18] sm:$0xff] }
  0x12   :  { %v561_v23 = vpop.eup %560  ;;  %v296_v26 = vmul.f32 %v559_v18, %v264_v0  ;;  %v306_v27 = vmul.f32 0.5, %v640_v3  ;;  %v307_v30 = vmul.f32 0.5, %v645_v4  ;;  %v438_v31 = vand.u32 2147483647, %v422_v17  ;;  %v425_v4 = vld [vmem:[%s861_s5 + $0x40] sm:$0xff]  ;;  %v329_v0 = vld [vmem:[%s862_s4 + $0x8] sm:$0xff] }
  0x13   :  { %v563_v28 = vpop.eup %562  ;;  %v297_v29 = vmul.f32 %v561_v23, %v265_v9  ;;  %v452_v32 = vadd.f32 %v451_v22, %v436_v10  ;;  %v308_v35 = vmul.f32 0.5, %v650_v5  ;;  %v309_v3 = vmul.f32 0.5, %v655_v6  ;;  %v427_v6 = vld [vmem:[%s861_s5 + $0x50] sm:$0xff]  ;;  %v332_v18 = vld [vmem:[%s862_s4 + $0x20] sm:$0xff] }
  0x14   :  { %v565_v33 = vpop.eup %564  ;;  %v298_v34 = vmul.f32 %v563_v28, %v266_v12  ;;  %v312_v36 = vadd.f32 %v304_v15, %v296_v26  ;;  %v439_v41 = vand.u32 2147483647, %v423_v1  ;;  %v310_v5 = vmul.f32 0.5, %v660_v7  ;;  %v330_v10 = vld [vmem:[%s862_s4 + $0x10] sm:$0xff] }
  0x15   :  { %v567_v37 = vpop.eup %566  ;;  %v299_v38 = vmul.f32 %v565_v33, %v267_v13  ;;  %v313_v39 = vadd.f32 %v305_v20, %v297_v29  ;;  %v453_v42 = vadd.f32 %v452_v32, %v437_v21  ;;  %v440_v46 = vand.u32 2147483647, %v424_v2  ;;  %v333_v20 = vld [vmem:[%s862_s4 + $0x28] sm:$0xff]  ;;  %v334_v26 = vld [vmem:[%s862_s4 + $0x30] sm:$0xff] }
  0x16   :  { %v569_v43 = vpop.eup %568  ;;  %v300_v44 = vmul.f32 %v567_v37, %v268_v14  ;;  %v314_v45 = vadd.f32 %v306_v27, %v298_v34  ;;  %v311_v55 = vmul.f32 0.5, %v687_v16  ;;  %v441_v57 = vand.u32 2147483647, %v425_v4  ;;  %v796_v14 = vld [vmem:[%s861_s5 + $0x70] sm:$0xff]  ;;  %v321_v33 = vld [vmem:[%s863_s3 + $0x8] sm:$0xff]  ;;  %v323_v4 = vld [vmem:[%s863_s3 + $0x18] sm:$0xff] }
  0x17   :  { %v571_v47 = vpop.eup %570  ;;  %v301_v48 = vmul.f32 %v569_v43, %v269_v19  ;;  %v315_v49 = vadd.f32 %v307_v30, %v299_v38  ;;  %v385_v50 = vadd.f32 %v313_v39, %v312_v36  ;;  %v454_v7 = vadd.f32 %v453_v42, %v438_v31  ;;  %v335_v30 = vld [vmem:[%s862_s4 + $0x38] sm:$0xff]  ;;  %v322_v34 = vld [vmem:[%s863_s3 + $0x10] sm:$0xff] }
  0x18   :  { %v573_v53 = vpop.eup %572  ;;  %v302_v54 = vmul.f32 %v571_v47, %v270_v24  ;;  %v442_v58 = vand.u32 2147483647, %v426_v40  ;;  %v316_v59 = vadd.f32 %v308_v35, %v300_v44  ;;  %v443_v61 = vand.u32 2147483647, %v427_v6  ;;  %v324_v40 = vld [vmem:[%s863_s3 + $0x20] sm:$0xff]  ;;  %v325_v6 = vld [vmem:[%s863_s3 + $0x28] sm:$0xff] }
  0x19   :  { %v386_v60 = vadd.f32 %v385_v50, %v314_v45  ;;  %v455_v62 = vadd.f32 %v454_v7, %v439_v41  ;;  %v303_v16 = vmul.f32 %v573_v53, %v271_v25  ;;  %v444_v8 = vand.u32 2147483647, %v766_v51  ;;  %v320_v25 = vld [vmem:[%s863_s3] sm:$0xff]  ;;  %v432_v47 = vld [vmem:[%s861_s5 + $0x78] sm:$0xff] }
  0x1a   :  { %v445_v9 = vand.u32 2147483647, %v771_v52  ;;  %v317_v12 = vadd.f32 %v309_v3, %v301_v48  ;;  %v446_v15 = vand.u32 2147483647, %v777_v56  ;;  %v318_v19 = vadd.f32 %v310_v5, %v302_v54  ;;  %v326_v52 = vld [vmem:[%s863_s3 + $0x30] sm:$0xff] }
  0x1b   :  { %v387_v13 = vadd.f32 %v386_v60, %v315_v49  ;;  %v456_v17 = vadd.f32 %v455_v62, %v440_v46  ;;  %v360_v21 = vmul.f32 1.442695, %v328_v63  ;;  %v362_v22 = vmul.f32 1.442695, %v329_v0 }
  0x1c   :  { %v364_v27 = vmul.f32 1.442695, %v330_v10  ;;  %v366_v1 = vmul.f32 1.442695, %v331_v11  ;;  %v319_v28 = vadd.f32 %v311_v55, %v303_v16  ;;  %v447_v29 = vand.u32 2147483647, %v796_v14 }
  0x1d   :  { %v388_v23 = vadd.f32 %v387_v13, %v316_v59  ;;  %v457_v24 = vadd.f32 %v456_v17, %v441_v57  ;;  %574 = vpow2.f32 %v360_v21  ;;  %v368_v2 = vmul.f32 1.442695, %v332_v18  ;;  %v327_v59 = vld [vmem:[%s863_s3 + $0x38] sm:$0xff] }
  0x1e   :  { %576 = vpow2.f32 %v362_v22  ;;  %v370_v35 = vmul.f32 1.442695, %v333_v20  ;;  %v336_v3 = vadd.f32 1.0, %v328_v63  ;;  %v344_v36 = vmul.f32 %v320_v25, %v320_v25 }
  0x1f   :  { %v389_v31 = vadd.f32 %v388_v23, %v317_v12  ;;  %v458_v32 = vadd.f32 %v457_v24, %v442_v58  ;;  %578 = vpow2.f32 %v364_v27  ;;  %v372_v37 = vmul.f32 1.442695, %v334_v26 }
  0x20   :  { %580 = vpow2.f32 %v366_v1  ;;  %v374_v41 = vmul.f32 1.442695, %v335_v30  ;;  %v337_v42 = vadd.f32 1.0, %v329_v0  ;;  %v345_v43 = vmul.f32 %v321_v33, %v321_v33 }
  0x21   :  { %v390_v38 = vadd.f32 %v389_v31, %v318_v19  ;;  %v459_v39 = vadd.f32 %v458_v32, %v443_v61  ;;  %v346_v44 = vmul.f32 %v322_v34, %v322_v34  ;;  %582 = vpow2.f32 %v368_v2 }
  0x22   :  { %v338_v46 = vadd.f32 1.0, %v330_v10  ;;  %584 = vpow2.f32 %v370_v35  ;;  %v339_v48 = vadd.f32 1.0, %v331_v11  ;;  %v347_v49 = vmul.f32 %v323_v4, %v323_v4 }
  0x23   :  { %v391_v5 = vadd.f32 %v390_v38, %v319_v28  ;;  %v460_v45 = vadd.f32 %v459_v39, %v444_v8  ;;  %v348_v50 = vmul.f32 %v324_v40, %v324_v40  ;;  %586 = vpow2.f32 %v372_v37 }
  0x24   :  { %v340_v7 = vadd.f32 1.0, %v332_v18  ;;  %v352_v53 = vsub.f32 %v336_v3, %v344_v36  ;;  %588 = vpow2.f32 %v374_v41  ;;  %v341_v54 = vadd.f32 1.0, %v333_v20  ;;  %v394_v41 = vld [vmem:[#allocation3] sm:$0xff] }
  0x25   :  { %471 = vadd.xlane.f32.xlu0 %v391_v5  ;;  %v461_v51 = vadd.f32 %v460_v45, %v445_v9  ;;  %v349_v55 = vmul.f32 %v325_v6, %v325_v6  ;;  %v353_v56 = vsub.f32 %v337_v42, %v345_v43  ;;  %v448_v57 = vand.u32 2147483647, %v432_v47 }
  0x26   :  { %v354_v60 = vsub.f32 %v338_v46, %v346_v44  ;;  %v342_v62 = vadd.f32 1.0, %v334_v26  ;;  %v350_v63 = vmul.f32 %v326_v52, %v326_v52  ;;  %v355_v0 = vsub.f32 %v339_v48, %v347_v49 }
  0x27   :  { %v462_v58 = vadd.f32 %v461_v51, %v446_v15  ;;  %v575_v61 = vpop.eup %574  ;;  %v356_v9 = vsub.f32 %v340_v7, %v348_v50  ;;  %v343_v12 = vadd.f32 1.0, %v335_v30  ;;  %v351_v13 = vmul.f32 %v327_v59, %v327_v59 }
  0x28   :  { %v577_v16 = vpop.eup %576  ;;  %v376_v10 = vsub.f32 %v352_v53, %v575_v61  ;;  %v357_v14 = vsub.f32 %v341_v54, %v349_v55  ;;  %v358_v22 = vsub.f32 %v342_v62, %v350_v63 }
  0x29   :  { %v463_v8 = vadd.f32 %v462_v58, %v447_v29  ;;  %v579_v11 = vpop.eup %578  ;;  %v377_v17 = vsub.f32 %v353_v56, %v577_v16  ;;  %v359_v29 = vsub.f32 %v343_v12, %v351_v13 }
  0x2a   :  { %v581_v18 = vpop.eup %580  ;;  %v378_v19 = vsub.f32 %v354_v60, %v579_v11  ;;  %v396_v20 = vsel %vm221_vm0, %v376_v10, 0.0 }
  0x2b   :  { %v464_v15 = vadd.f32 %v463_v8, %v448_v57  ;;  %v583_v21 = vpop.eup %582  ;;  %v379_v23 = vsub.f32 %v355_v0, %v581_v18  ;;  %v397_v24 = vsel %vm221_vm0, %v377_v17, 0.0 }
  0x2c   :  { %v585_v25 = vpop.eup %584  ;;  %v380_v26 = vsub.f32 %v356_v9, %v583_v21  ;;  %v398_v27 = vadd.f32 %v397_v24, %v396_v20  ;;  %v399_v1 = vsel %vm221_vm0, %v378_v19, 0.0 }
  0x2d   :  { %497 = vadd.xlane.f32.xlu1 %v464_v15  ;;  %v587_v28 = vpop.eup %586  ;;  %v381_v30 = vsub.f32 %v357_v14, %v585_v25  ;;  %v401_v2 = vsel %vm221_vm0, %v379_v23, 0.0 }
  0x2e   :  { %v589_v31 = vpop.eup %588  ;;  %v400_v32 = vadd.f32 %v399_v1, %v398_v27  ;;  %v382_v33 = vsub.f32 %v358_v22, %v587_v28  ;;  %v403_v34 = vsel %vm221_vm0, %v380_v26, 0.0 }
  0x2f   :  { %v383_v3 = vsub.f32 %v359_v29, %v589_v31  ;;  %v405_v36 = vsel %vm221_vm0, %v381_v30, 0.0 }
  0x30   :  { %v402_v35 = vadd.f32 %v401_v2, %v400_v32  ;;  %v407_v38 = vsel %vm221_vm0, %v382_v33, 0.0 }
  0x31   :  { %v409_v4 = vsel %vm221_vm0, %v383_v3, 0.0 }
  0x32   :  { %v404_v37 = vadd.f32 %v403_v34, %v402_v35 }
  0x34   :  { %v406_v39 = vadd.f32 %v405_v36, %v404_v37 }
  0x36   :  { %v408_v40 = vadd.f32 %v407_v38, %v406_v39 }
  0x38   :  { %v410_v42 = vadd.f32 %v409_v4, %v408_v40 }
  0x3a   :  { %v411_v43 = vadd.f32 %v410_v42, %v394_v41 }
  0x3c   :  { %412 = vst.msk [vmem:[#allocation3] sm:$0xff] %vm221_vm0, %v411_v43 }
  0x43   :  { %v482_v44 = vld [vmem:[#allocation3] sm:$0xff] }
  0x44   :  { %v483_v5 = vsel %vm221_vm0, %v482_v44, 0.0 }
  0x45   :  { %484 = vadd.xlane.f32.xlu0 %v483_v5 }
  0xb2   :  { %v472_v45 = vpop.xlane.xlu0 %471 }
  0xb3   :  { %v473_v6 = vrot.slane %v472_v45, 4 }
  0xb5   :  { %v474_v46 = vadd.f32 %v473_v6, %v472_v45 }
  0xb7   :  { %v475_v47 = vrot.slane %v474_v46, 2 }
  0xb9   :  { %v476_v48 = vadd.f32 %v475_v47, %v474_v46 }
  0xba   :  { %v498_v51 = vpop.xlane.xlu1 %497 }
  0xbb   :  { %v477_v49 = vrot.slane %v476_v48, 1  ;;  %v499_v52 = vrot.slane %v498_v51, 4 }
  0xbd   :  { %v478_v50 = vadd.f32 %v477_v49, %v476_v48  ;;  %v500_v7 = vadd.f32 %v499_v52, %v498_v51 }
  0xbf   :  { %551 = vpush %v478_v50  ;;  %v501_v53 = vrot.slane %v500_v7, 2 }
  0xc1   :  { %v502_v57 = vadd.f32 %v501_v53, %v500_v7 }
  0xc3   :  { %v503_v60 = vrot.slane %v502_v57, 1 }
  0xc5   :  { %v504_v63 = vadd.f32 %v503_v60, %v502_v57 }
  0xd2   :  { %v485_v54 = vpop.xlane.xlu0 %484 }
  0xd3   :  { %v486_v55 = vrot.slane %v485_v54, 4 }
  0xd5   :  { %v487_v56 = vadd.f32 %v486_v55, %v485_v54 }
  0xd7   :  { %v488_v58 = vrot.slane %v487_v56, 2 }
  0xd9   :  { %v489_v59 = vadd.f32 %v488_v58, %v487_v56 }
  0xdb   :  { %v490_v61 = vrot.slane %v489_v59, 1 }
  0xdd   :  { %v491_v62 = vadd.f32 %v490_v61, %v489_v59 }
  0xdf   :  { %553 = vpush %v491_v62 }
  0xe0   :  { %555 = vpush %v504_v63 }
  0xf0   :  { %s552_s3 = spop %551 }
  0xf1   :  { %v480_v0 = vstv %s552_s3 }
  0xf2   :  { %481 = vst [vmem:[%s864_s6] sm:$0xff] %v480_v0 }
 0x110   :  { %s554_s28 = spop %553 }
 0x111   :  { %v493_v16 = vstv %s554_s28  ;;  %s556_s29 = spop %555 }
 0x112   :  { %549 = vst [vmem:[%s864_s6 + $0x8] sm:$0xff] %v493_v16  ;;  %v506_v8 = vstv %s556_s29 }
 0x113   :  { %550 = vst [vmem:[%s864_s6 + $0x10] sm:$0xff] %v506_v8 }

</bundles_post_ra>
